<compile_context>
chip_gen: v5e
topology: v5e:2x2
jax: 0.10.0
libtpu: 0.0.40
codegen_flags: <defaults>
</compile_context>

<pallas_src>
import jax
import jax.numpy as jnp
from jax.experimental import pallas as pl
from jax.experimental.pallas import tpu as pltpu

_LANES = 128  # lane-dense output width


def _critic_kernel(x_ref, a_ref, w1s_ref, w1a_ref, b1_ref, w2_ref, b2_ref,
                   w3p_ref, b3p_ref, out_ref):
    # fc1 (split over [x | a]) + relu   -- both dots share one MXU pass worth
    # of work at these sizes; accumulation stays in f32.
    h1 = (jnp.dot(x_ref[...], w1s_ref[...], preferred_element_type=jnp.float32)
          + jnp.dot(a_ref[...], w1a_ref[...], preferred_element_type=jnp.float32)
          + b1_ref[...])
    h1 = jnp.maximum(h1, 0.0)

    # fc2 + relu
    h2 = jnp.dot(h1, w2_ref[...], preferred_element_type=jnp.float32) + b2_ref[...]
    h2 = jnp.maximum(h2, 0.0)

    # fc_out, computed against a lane-padded [H, 128] weight so the output
    # store is a full-width unmasked vst (only column 0 carries the Q value).
    out_ref[...] = (jnp.dot(h2, w3p_ref[...], preferred_element_type=jnp.float32)
                    + b3p_ref[...]).astype(out_ref.dtype)


def critic_forward(x, a, params, *, block_b=512):
    """Pallas implementation of CriticNetwork.forward(x, a) -> [B, 1]."""
    w1, b1, w2, b2, w3, b3 = params
    B, state_dim = x.shape
    action_dim = a.shape[1]
    H = w1.shape[1]

    # Split fc1 weight so the concat never materializes.
    w1_s = w1[:state_dim, :]
    w1_a = w1[state_dim:, :]

    # Lane-dense output: pad fc_out params to 128 output lanes with zeros.
    w3_pad = jnp.zeros((H, _LANES), jnp.float32).at[:, :1].set(w3)
    b3_pad = jnp.zeros((1, _LANES), jnp.float32).at[:, :1].set(b3)

    # Batch tiling: big TB amortizes the ~0.35us/step overhead; VMEM is not a
    # constraint on any generation at these sizes. Pad B to a multiple of TB.
    tb = block_b if B >= block_b else max(8, ((B + 7) // 8) * 8)
    b_pad = ((B + tb - 1) // tb) * tb
    if b_pad != B:
        x = jnp.pad(x, ((0, b_pad - B), (0, 0)))
        a = jnp.pad(a, ((0, b_pad - B), (0, 0)))
    num_blocks = b_pad // tb

    act_spec = lambda d: pl.BlockSpec((tb, d), lambda i: (i, 0))
    # Constant block index -> weights/biases stay resident in VMEM across steps.
    resident = lambda arr: pl.BlockSpec(arr.shape, lambda i: (0, 0))

    flops = 2 * B * ((state_dim + action_dim) * H + H * H + H)
    bytes_accessed = 4 * (B * (state_dim + action_dim + 1)
                          + (state_dim + action_dim) * H + H
                          + H * H + H + H * _LANES + _LANES)

    out_full = pl.pallas_call(
        _critic_kernel,
        out_shape=jax.ShapeDtypeStruct((b_pad, _LANES), jnp.float32),
        grid=(num_blocks,),
        in_specs=[act_spec(state_dim), act_spec(action_dim),
                  resident(w1_s), resident(w1_a), resident(b1),
                  resident(w2), resident(b2),
                  resident(w3_pad), resident(b3_pad)],
        out_specs=pl.BlockSpec((tb, _LANES), lambda i: (i, 0)),
        compiler_params=pltpu.CompilerParams(
            dimension_semantics=("parallel",)),
        cost_estimate=pl.CostEstimate(flops=flops, transcendentals=0,
                                      bytes_accessed=bytes_accessed),
    )(x, a, w1_s, w1_a, b1, w2, b2, w3_pad, b3_pad)

    return out_full[:B, :1]


def init_params(key, state_dim, hidden_dim, action_dim):
    """Deterministic init mimicking nn.Linear shapes (weights stored [in, out])."""
    ks = jax.random.split(key, 6)
    in1 = state_dim + action_dim

    def linear(kw, kb, fan_in, fan_out):
        bound = 1.0 / jnp.sqrt(fan_in)
        w = jax.random.uniform(kw, (fan_in, fan_out), jnp.float32, -bound, bound)
        b = jax.random.uniform(kb, (1, fan_out), jnp.float32, -bound, bound)
        return w, b

    w1, b1 = linear(ks[0], ks[1], in1, hidden_dim)
    w2, b2 = linear(ks[2], ks[3], hidden_dim, hidden_dim)
    w3, b3 = linear(ks[4], ks[5], hidden_dim, 1)
    return (w1, b1, w2, b2, w3, b3)


def _reference(x, a, params):
    w1, b1, w2, b2, w3, b3 = params
    cat = jnp.concatenate([x, a], axis=1)
    h1 = jnp.maximum(cat @ w1 + b1, 0.0)
    h2 = jnp.maximum(h1 @ w2 + b2, 0.0)
    return h2 @ w3 + b3


if __name__ == "__main__":
    # Hopper-like sizes, kept small: state_dim=11, action_dim=3, hidden=32.
    state_dim, action_dim, hidden_dim = 11, 3, 32
    batch = 2

    key = jax.random.PRNGKey(0)
    kx, ka, kp = jax.random.split(key, 3)
    x = jax.random.normal(kx, (batch, state_dim), jnp.float32)
    a = jax.random.normal(ka, (batch, action_dim), jnp.float32)
    params = init_params(kp, state_dim, hidden_dim, action_dim)

    out = critic_forward(x, a, params)
    out = jax.block_until_ready(out)

    ref = _reference(x, a, params)
    assert out.shape == (batch, 1), out.shape
    assert jnp.allclose(out, ref, atol=1e-5, rtol=1e-5), (out, ref)

    # Also exercise a larger, ragged batch to validate the tiled/padded path.
    kx2, ka2 = jax.random.split(jax.random.PRNGKey(1))
    xb = jax.random.normal(kx2, (1030, state_dim), jnp.float32)
    ab = jax.random.normal(ka2, (1030, action_dim), jnp.float32)
    out_b = jax.block_until_ready(critic_forward(xb, ab, params))
    ref_b = _reference(xb, ab, params)
    assert out_b.shape == (1030, 1), out_b.shape
    assert jnp.allclose(out_b, ref_b, atol=1e-5, rtol=1e-5)

    print("KERNEL_OK")
</pallas_src>

<mosaic_0001>
module attributes {stable_mosaic.version = 11 : i64} {
  func.func @_critic_kernel(%arg0: i32, %arg1: memref<8x11xf32, #tpu.memory_space<vmem>>, %arg2: memref<8x3xf32, #tpu.memory_space<vmem>>, %arg3: memref<11x32xf32, #tpu.memory_space<vmem>>, %arg4: memref<3x32xf32, #tpu.memory_space<vmem>>, %arg5: memref<1x32xf32, #tpu.memory_space<vmem>>, %arg6: memref<32x32xf32, #tpu.memory_space<vmem>>, %arg7: memref<1x32xf32, #tpu.memory_space<vmem>>, %arg8: memref<32x128xf32, #tpu.memory_space<vmem>>, %arg9: memref<1x128xf32, #tpu.memory_space<vmem>>, %arg10: memref<8x128xf32, #tpu.memory_space<vmem>>) attributes {dimension_semantics = [#tpu.dimension_semantics<parallel>], iteration_bounds = array<i64: 1>, scalar_prefetch = 0 : i64, scratch_operands = 0 : i64, tpu.core_type = #tpu.core_type<tc>, window_params = [{transform_indices = @transform_0, window_bounds = array<i64: 8, 11>}, {transform_indices = @transform_1, window_bounds = array<i64: 8, 3>}, {pipeline_mode = #tpu.pipeline_mode<synchronous>, transform_indices = @transform_2, window_bounds = array<i64: 11, 32>}, {pipeline_mode = #tpu.pipeline_mode<synchronous>, transform_indices = @transform_3, window_bounds = array<i64: 3, 32>}, {pipeline_mode = #tpu.pipeline_mode<synchronous>, transform_indices = @transform_4, window_bounds = array<i64: 1, 32>}, {pipeline_mode = #tpu.pipeline_mode<synchronous>, transform_indices = @transform_5, window_bounds = array<i64: 32, 32>}, {pipeline_mode = #tpu.pipeline_mode<synchronous>, transform_indices = @transform_6, window_bounds = array<i64: 1, 32>}, {pipeline_mode = #tpu.pipeline_mode<synchronous>, transform_indices = @transform_7, window_bounds = array<i64: 32, 128>}, {pipeline_mode = #tpu.pipeline_mode<synchronous>, transform_indices = @transform_8, window_bounds = array<i64: 1, 128>}, {transform_indices = @transform_9, window_bounds = array<i64: 8, 128>}]} {
    %c0 = arith.constant 0 : index
    %c0_0 = arith.constant 0 : index
    %0 = vector.load %arg1[%c0, %c0_0] : memref<8x11xf32, #tpu.memory_space<vmem>>, vector<8x11xf32>
    %c0_1 = arith.constant 0 : index
    %c0_2 = arith.constant 0 : index
    %1 = vector.load %arg3[%c0_1, %c0_2] : memref<11x32xf32, #tpu.memory_space<vmem>>, vector<11x32xf32>
    %cst = arith.constant dense<0.000000e+00> : vector<8x32xf32>
    %2 = tpu.matmul %0, %1, %cst {dimension_numbers = #tpu.dot_dimension_numbers<[1], [0], [0], [1], [0, 0, 1, 1], [], []>} : vector<8x11xf32>, vector<11x32xf32>, vector<8x32xf32> -> vector<8x32xf32>
    %c0_3 = arith.constant 0 : index
    %c0_4 = arith.constant 0 : index
    %3 = vector.load %arg2[%c0_3, %c0_4] : memref<8x3xf32, #tpu.memory_space<vmem>>, vector<8x3xf32>
    %c0_5 = arith.constant 0 : index
    %c0_6 = arith.constant 0 : index
    %4 = vector.load %arg4[%c0_5, %c0_6] : memref<3x32xf32, #tpu.memory_space<vmem>>, vector<3x32xf32>
    %cst_7 = arith.constant dense<0.000000e+00> : vector<8x32xf32>
    %5 = tpu.matmul %3, %4, %cst_7 {dimension_numbers = #tpu.dot_dimension_numbers<[1], [0], [0], [1], [0, 0, 1, 1], [], []>} : vector<8x3xf32>, vector<3x32xf32>, vector<8x32xf32> -> vector<8x32xf32>
    %6 = arith.addf %2, %5 : vector<8x32xf32>
    %c0_8 = arith.constant 0 : index
    %c0_9 = arith.constant 0 : index
    %7 = vector.load %arg5[%c0_8, %c0_9] : memref<1x32xf32, #tpu.memory_space<vmem>>, vector<1x32xf32>
    %8 = vector.broadcast %7 : vector<1x32xf32> to vector<8x32xf32>
    %9 = arith.addf %6, %8 : vector<8x32xf32>
    %cst_10 = arith.constant 0.000000e+00 : f32
    %10 = vector.broadcast %cst_10 : f32 to vector<8x32xf32>
    %11 = arith.maximumf %9, %10 : vector<8x32xf32>
    %c0_11 = arith.constant 0 : index
    %c0_12 = arith.constant 0 : index
    %12 = vector.load %arg6[%c0_11, %c0_12] : memref<32x32xf32, #tpu.memory_space<vmem>>, vector<32x32xf32>
    %cst_13 = arith.constant dense<0.000000e+00> : vector<8x32xf32>
    %13 = tpu.matmul %11, %12, %cst_13 {dimension_numbers = #tpu.dot_dimension_numbers<[1], [0], [0], [1], [0, 0, 1, 1], [], []>} : vector<8x32xf32>, vector<32x32xf32>, vector<8x32xf32> -> vector<8x32xf32>
    %c0_14 = arith.constant 0 : index
    %c0_15 = arith.constant 0 : index
    %14 = vector.load %arg7[%c0_14, %c0_15] : memref<1x32xf32, #tpu.memory_space<vmem>>, vector<1x32xf32>
    %15 = vector.broadcast %14 : vector<1x32xf32> to vector<8x32xf32>
    %16 = arith.addf %13, %15 : vector<8x32xf32>
    %cst_16 = arith.constant 0.000000e+00 : f32
    %17 = vector.broadcast %cst_16 : f32 to vector<8x32xf32>
    %18 = arith.maximumf %16, %17 : vector<8x32xf32>
    %c0_17 = arith.constant 0 : index
    %c0_18 = arith.constant 0 : index
    %19 = vector.load %arg8[%c0_17, %c0_18] : memref<32x128xf32, #tpu.memory_space<vmem>>, vector<32x128xf32>
    %cst_19 = arith.constant dense<0.000000e+00> : vector<8x128xf32>
    %20 = tpu.matmul %18, %19, %cst_19 {dimension_numbers = #tpu.dot_dimension_numbers<[1], [0], [0], [1], [0, 0, 1, 1], [], []>} : vector<8x32xf32>, vector<32x128xf32>, vector<8x128xf32> -> vector<8x128xf32>
    %c0_20 = arith.constant 0 : index
    %c0_21 = arith.constant 0 : index
    %21 = vector.load %arg9[%c0_20, %c0_21] : memref<1x128xf32, #tpu.memory_space<vmem>>, vector<1x128xf32>
    %22 = vector.broadcast %21 : vector<1x128xf32> to vector<8x128xf32>
    %23 = arith.addf %20, %22 : vector<8x128xf32>
    %c0_22 = arith.constant 0 : index
    %c0_23 = arith.constant 0 : index
    %24 = vector.load %arg10[%c0_22, %c0_23] : memref<8x128xf32, #tpu.memory_space<vmem>>, vector<8x128xf32>
    tpu.vector_store %arg10[%c0_22, %c0_23], %23 {strides = array<i32>} : memref<8x128xf32, #tpu.memory_space<vmem>>, vector<8x128xf32>,
    return
  }
  func.func @transform_0(%arg0: i32) -> (i32, i32) {
    %c0_i32 = arith.constant 0 : i32
    %c0_i32_0 = arith.constant 0 : i32
    return %arg0, %c0_i32 : i32, i32
  }
  func.func @transform_1(%arg0: i32) -> (i32, i32) {
    %c0_i32 = arith.constant 0 : i32
    %c0_i32_0 = arith.constant 0 : i32
    return %arg0, %c0_i32 : i32, i32
  }
  func.func @transform_2(%arg0: i32) -> (i32, i32) {
    %c0_i32 = arith.constant 0 : i32
    %c0_i32_0 = arith.constant 0 : i32
    %c0_i32_1 = arith.constant 0 : i32
    return %c0_i32, %c0_i32_0 : i32, i32
  }
  func.func @transform_3(%arg0: i32) -> (i32, i32) {
    %c0_i32 = arith.constant 0 : i32
    %c0_i32_0 = arith.constant 0 : i32
    %c0_i32_1 = arith.constant 0 : i32
    return %c0_i32, %c0_i32_0 : i32, i32
  }
  func.func @transform_4(%arg0: i32) -> (i32, i32) {
    %c0_i32 = arith.constant 0 : i32
    %c0_i32_0 = arith.constant 0 : i32
    %c0_i32_1 = arith.constant 0 : i32
    return %c0_i32, %c0_i32_0 : i32, i32
  }
  func.func @transform_5(%arg0: i32) -> (i32, i32) {
    %c0_i32 = arith.constant 0 : i32
    %c0_i32_0 = arith.constant 0 : i32
    %c0_i32_1 = arith.constant 0 : i32
    return %c0_i32, %c0_i32_0 : i32, i32
  }
  func.func @transform_6(%arg0: i32) -> (i32, i32) {
    %c0_i32 = arith.constant 0 : i32
    %c0_i32_0 = arith.constant 0 : i32
    %c0_i32_1 = arith.constant 0 : i32
    return %c0_i32, %c0_i32_0 : i32, i32
  }
  func.func @transform_7(%arg0: i32) -> (i32, i32) {
    %c0_i32 = arith.constant 0 : i32
    %c0_i32_0 = arith.constant 0 : i32
    %c0_i32_1 = arith.constant 0 : i32
    return %c0_i32, %c0_i32_0 : i32, i32
  }
  func.func @transform_8(%arg0: i32) -> (i32, i32) {
    %c0_i32 = arith.constant 0 : i32
    %c0_i32_0 = arith.constant 0 : i32
    %c0_i32_1 = arith.constant 0 : i32
    return %c0_i32, %c0_i32_0 : i32, i32
  }
  func.func @transform_9(%arg0: i32) -> (i32, i32) {
    %c0_i32 = arith.constant 0 : i32
    %c0_i32_0 = arith.constant 0 : i32
    return %arg0, %c0_i32 : i32, i32
  }
}

</mosaic_0001>

<bundles_post_ra>
// kernel: tpu_custom_call.1
= control target key start
LH: loop header
LB: loop body
LE: loop exit
PB: predicated region body
PF: predicated region fallthrough
CT: control target
= control target key end

     0   :  { %14 = vsyncpa [#allocation3], 0  ;;  %s432_s0 = inlined_call_operand.vmem [shape: f32[8,11], index: 0, kind: input, shape index: {}]   ;;  %s433_s1 = inlined_call_operand.vmem [shape: f32[8,3], index: 1, kind: input, shape index: {}]   ;;  %s434_s2 = inlined_call_operand.hbm [shape: f32[11,32], index: 2, kind: input, shape index: {}]   ;;  %s435_s3 = inlined_call_operand.vmem [shape: f32[3,32], index: 3, kind: input, shape index: {}]   ;;  %s436_s4 = inlined_call_operand.vmem [shape: f32[1,32], index: 4, kind: input, shape index: {}]   ;;  %s437_s5 = inlined_call_operand.hbm [shape: f32[32,32], index: 5, kind: input, shape index: {}]   ;;  %s438_s6 = inlined_call_operand.vmem [shape: f32[1,32], index: 6, kind: input, shape index: {}]   ;;  %s439_s7 = inlined_call_operand.hbm [shape: f32[32,128], index: 7, kind: input, shape index: {}]   ;;  %s440_s8 = inlined_call_operand.vmem [shape: f32[1,128], index: 8, kind: input, shape index: {}]   ;;  %s441_s9 = inlined_call_operand.hbm [shape: f32[8,128], index: 9, kind: output, shape index: {}]  }
   0x1   :  { %15 = vsyncpa [#allocation6], 0 }
   0x2   :  { %16 = vsyncpa [#allocation4], 0  ;;  %s42_s11 = sshll.u32 %s437_s5, 4  ;;  %s346_s12 = smov [#allocation5]   ;;  %s43_s11 = int_to_ptr.hbm [resolvable:$true] %s42_s11 }
   0x3   :  { %s44_s13 = sshll.u32 %s346_s12, 4  ;;  %s25_s16 = sshll.u32 %s434_s2, 4  ;;  %s45_s13 = int_to_ptr.vmem [resolvable:$true] %s44_s13  ;;  %s26_s16 = int_to_ptr.hbm [resolvable:$true] %s25_s16 }
   0x4   :  { %s347_s17 = smov 128   ;;  %s348_s18 = smov 8  }
   0x5   :  { %50 = dma.hbm_to_vmem [thread:$0]  %s43_s11, 512, %s45_s13, [#allocation6], %s347_s17, %s347_s17, %s348_s18  }
   0x6   :  { %s349_s19 = smov [#allocation2]   ;;  %s57_s23 = sshll.u32 %s439_s7, 4  ;;  %s58_s23 = int_to_ptr.hbm [resolvable:$true] %s57_s23 }
   0x7   :  { %s27_s20 = sshll.u32 %s349_s19, 4  ;;  %s350_s5 = smov [#allocation7]   ;;  %s28_s20 = int_to_ptr.vmem [resolvable:$true] %s27_s20 }
   0x8   :  { %33 = dma.hbm_to_vmem [thread:$0]  %s26_s16, 256, %s28_s20, [#allocation3], %s347_s17, %s347_s17, %s348_s18  }
   0x9   :  { %s59_s24 = sshll.u32 %s350_s5, 4  ;;  %s60_s24 = int_to_ptr.vmem [resolvable:$true] %s59_s24 }
   0xa   :  { %65 = dma.hbm_to_vmem [thread:$0]  %s58_s23, 512, %s60_s24, [#allocation6], %s347_s17, %s347_s17, %s348_s18  }
   0xb   :  { %340 = dma.done.wait [#allocation3], 256  }
   0xc   :  { %341 = vsyncadd [#allocation3], 4294967040 }
   0xd   :  { %342 = dma.done.wait [#allocation6], 1024  }
   0xe   :  { %343 = vsyncadd [#allocation6], 4294966272  ;;  %vm89_vm0 = vcmask 1042432   ;;  %vm85_vm1 = vcmask 23552   ;;  %v82_v0 = vld [vmem:[#allocation2 + $0x8] sm:$0x7] }
   0xf   :  { %v84_v1 = vld [vmem:[%s435_s3] sm:$0x7]  ;;  %231 = vmatpush.msk.msra.mxu1 %vm89_vm0, %v82_v0  ;;  %vm113_vm2 = vcmask 89088   ;;  %v149_v5 = vld [vmem:[#allocation5 + $0x18] sm:$0xff]  ;;  %v147_v7 = vld [vmem:[#allocation5 + $0x8] sm:$0xff]  ;;  %vm154_vm3 = vcmask 261120  }
  0x10   :  { %v81_v2 = vld [vmem:[#allocation2] sm:$0xff]  ;;  %229 = vmatpush.msk.msra.mxu0 %vm89_vm0, %v84_v1  ;;  %170 = vmatpush.msra.mxu2 %v149_v5  ;;  %v146_v8 = vld [vmem:[#allocation5] sm:$0xff]  ;;  %v182_v9 = vld [vmem:[#allocation7 + $0x18] sm:$0xff]  ;;  %s351_s10 = smov [#allocation8]   ;;  %s218_s14 = sshll.u32 %s441_s9, 4  ;;  %s219_s14 = int_to_ptr.hbm [resolvable:$true] %s218_s14 }
  0x11   :  { %v83_v3 = vld [vmem:[%s433_s1] sm:$0xff]  ;;  %135 = vmatpush.msra.mxu1 %v81_v2  ;;  %202 = vmatpush.msra.mxu3 %v182_v9  ;;  %v180_v17 = vld [vmem:[#allocation7 + $0x8] sm:$0xff]  ;;  %v179_v18 = vld [vmem:[#allocation7] sm:$0xff]  ;;  %s216_s11 = sshll.u32 %s351_s10, 4  ;;  %s217_s11 = int_to_ptr.vmem [resolvable:$true] %s216_s11 }
  0x12   :  { %v80_v4 = vld [vmem:[%s432_s0] sm:$0xff]  ;;  %230 = vmatmul.msk.f32.vlgmr.msra.gmra.mxu0 %vm85_vm1, %v83_v3 }
  0x13   :  { %232 = vmatmul.msk.f32.vlgmr.msra.gmra.mxu1 %vm113_vm2, %v80_v4  ;;  %v148_v6 = vld [vmem:[#allocation5 + $0x10] sm:$0xff] }
  0x14   :  { %171 = vmatpush.msra.mxu2 %v148_v6  ;;  %v241_v11 = vld [vmem:[%s436_s4] ss:$0 sm:$0xff] }
  0x15   :  { %v181_v16 = vld [vmem:[#allocation7 + $0x10] sm:$0xff] }
  0x16   :  { %172 = vmatpush.msra.mxu2 %v147_v7  ;;  %203 = vmatpush.msra.mxu3 %v181_v16  ;;  %v242_v19 = vld [vmem:[%s438_s6] ss:$0 sm:$0xff] }
  0x17   :  { %v243_v23 = vld [vmem:[%s440_s8] ss:$0 sm:$0xff] }
  0x18   :  { %173 = vmatpush.msra.mxu2 %v146_v8  ;;  %204 = vmatpush.msra.mxu3 %v180_v17 }
  0x1a   :  { %205 = vmatpush.msra.mxu3 %v179_v18 }
  0x8f   :  { %v110_v10 = vpop.f32.mrf.mxu0 }
  0x90   :  { %v137_v12 = vpop.f32.mrf.mxu1 }
  0x91   :  { %v138_v13 = vadd.f32 %v137_v12, %v110_v10 }
  0x93   :  { %v144_v14 = vadd.f32 %v241_v11, %v138_v13 }
  0x95   :  { %v145_v15 = vmax.f32 %v144_v14, 0.0 }
  0x97   :  { %233 = vmatmul.msk.f32.vlgmr.msra.gmra.mxu2 %vm154_vm3, %v145_v15 }
 0x11a   :  { %v175_v20 = vpop.f32.mrf.mxu2 }
 0x11b   :  { %v176_v21 = vadd.f32 %v242_v19, %v175_v20 }
 0x11d   :  { %v178_v22 = vmax.f32 %v176_v21, 0.0 }
 0x11f   :  { %234 = vmatmul.msk.f32.vlgmr.msra.gmra.mxu3 %vm154_vm3, %v178_v22 }
 0x1a2   :  { %v207_v24 = vpop.f32.mrf.mxu3 }
 0x1a3   :  { %v208_v25 = vadd.f32 %v243_v23, %v207_v24 }
 0x1a5   :  { %210 = vst [vmem:[#allocation8] sm:$0xff] %v208_v25 }
 0x1a6   :  { %221 = dma.vmem_to_hbm [thread:$0]  %s217_s11, 128, %s219_s14, [#allocation4]  }
 0x1a7   :  { %344 = dma.done.wait [#allocation4], 128  }
 0x1a8   :  { %345 = vsyncadd [#allocation4], 4294967168 }
 0x1a9   :  { %226 = vsyncpa [#allocation3], 1 }
 0x1aa   :  { %227 = vsyncpa [#allocation6], 1 }
 0x1ab   :  { %228 = vsyncpa [#allocation4], 1 }

</bundles_post_ra>
